<compile_context>
chip_gen: v7x
topology: tpu7x:2x2x1
jax: 0.10.0
libtpu: 0.0.40
codegen_flags: <defaults>
</compile_context>

<pallas_src>
import jax
import jax.numpy as jnp
from jax import lax
from jax.experimental import pallas as pl
from jax.experimental.pallas import tpu as pltpu


def _norm_kernel(x_ref, o_ref):
    """One (B, TF) block: normalize every column over the batch (sublane) axis.

    Every op here is strictly per-column (batch reductions + elementwise), so
    the masked trailing feature block is safe: garbage in out-of-bounds lanes
    can never leak into valid columns, and OOB lanes are masked on writeback.
    Do NOT add any op that mixes lanes (lane-axis reductions, rolls, ...).
    """
    x = x_ref[...].astype(jnp.float32)                     # (B, TF)
    n = x.shape[0]

    # Batch reduction on the MXU (ones-row matmul) instead of an XLU sublane
    # reduction tree: keeps v7x HBM-bound after its bandwidth jump; neutral on
    # v5e/v6e which are HBM-bound either way. HIGHEST precision keeps full f32
    # accuracy for the 1e-5 tolerance.
    ones = jnp.ones((1, n), jnp.float32)
    mean = jnp.dot(ones, x, preferred_element_type=jnp.float32,
                   precision=lax.Precision.HIGHEST) * (1.0 / n)   # (1, TF)
    diff = x - mean                                        # (B, TF)

    # torch.std default is unbiased (divide by N-1); B=1 -> NaN, like torch.
    inv_nm1 = (1.0 / (n - 1)) if n > 1 else float("nan")
    var = jnp.dot(ones, diff * diff, preferred_element_type=jnp.float32,
                  precision=lax.Precision.HIGHEST) * inv_nm1      # (1, TF)
    std = jnp.sqrt(var)

    # Eps on std (not var) to match torch numerics. Per-column reciprocal +
    # VPU multiply instead of B*TF per-element divides; approx=False keeps
    # full f32 accuracy.
    scale = pl.reciprocal(std + 1e-5, approx=False)        # (1, TF)
    o_ref[...] = (diff * scale).astype(o_ref.dtype)


def my_normalization(x):
    """x: (B, C, H, W) -> same shape, normalized over dim 0 (batch)."""
    B, C, H, W = x.shape
    F = C * H * W
    x2 = x.reshape(B, F)
    itemsize = jnp.dtype(x.dtype).itemsize

    # ---- Generation-aware VMEM budget ---------------------------------------
    try:
        vmem_phys = pltpu.get_tpu_info().vmem_capacity_bytes
    except Exception:
        vmem_phys = 64 << 20                    # conservative (v7x per-TC)
    # Per-step live footprint = double-buffered input + output blocks. Cap at
    # 24 MiB (well past the ~1-4 MiB/buffer HBM-roofline plateau) and never
    # assume more than ~1/3 of physical VMEM so v7x (64 MiB) keeps headroom
    # for Mosaic internal scratch and the in-kernel f32 temporaries.
    vmem_budget = min(24 << 20, vmem_phys // 3)

    bytes_per_lane_col = 2 * 2 * B * itemsize   # 2 bufs x (in + out) per lane col
    budget_tile = max(128, (vmem_budget // bytes_per_lane_col) // 128 * 128)

    f_rounded = pl.cdiv(F, 128) * 128           # F padded to lane width
    grid_f = max(1, pl.cdiv(f_rounded, budget_tile))
    # Keep >= 2 feature blocks when possible so ("parallel",) can shard blocks
    # across v7x's two TensorCores; on v5e/v6e this is just one extra cheap
    # serial grid step.
    if grid_f < 2 and f_rounded >= 256:
        grid_f = 2
    # Balance tiles (largest 128-multiple covering f_rounded in grid_f blocks)
    # so the trailing block is never nearly empty (avoids wasted vst.msk work).
    tile_f = pl.cdiv(f_rounded // 128, grid_f) * 128
    grid_f = pl.cdiv(f_rounded, tile_f)

    footprint = 2 * 2 * B * tile_f * itemsize
    vmem_limit = min(int(vmem_phys * 3 // 4), max(32 << 20, 2 * footprint))

    out2 = pl.pallas_call(
        _norm_kernel,
        out_shape=jax.ShapeDtypeStruct((B, F), x.dtype),
        grid_spec=pltpu.PrefetchScalarGridSpec(
            num_scalar_prefetch=0,
            grid=(grid_f,),
            in_specs=[pl.BlockSpec((B, tile_f), lambda j: (0, j))],
            out_specs=pl.BlockSpec((B, tile_f), lambda j: (0, j)),
        ),
        compiler_params=pltpu.CompilerParams(
            dimension_semantics=("parallel",),   # feature blocks independent
            vmem_limit_bytes=int(vmem_limit),
        ),
        cost_estimate=pl.CostEstimate(
            flops=6 * B * F,
            transcendentals=2 * F,
            bytes_accessed=2 * B * F * itemsize,
        ),
    )(x2)

    return out2.reshape(B, C, H, W)


if __name__ == "__main__":
    key = jax.random.PRNGKey(0)
    # Small NCHW input: batch=8, channels=4, spatial=16x16.
    x = jax.random.normal(key, (8, 4, 16, 16), dtype=jnp.float32)

    out = my_normalization(x)
    out = jax.block_until_ready(out)

    # Pure-JAX reference (matches torch semantics: unbiased std over dim 0).
    mean = jnp.mean(x, axis=0, keepdims=True)
    std = jnp.sqrt(jnp.sum((x - mean) ** 2, axis=0, keepdims=True) / (x.shape[0] - 1))
    ref = (x - mean) / (std + 1e-5)
    assert out.shape == x.shape and out.dtype == x.dtype
    assert jnp.allclose(out, ref, atol=1e-5, rtol=1e-5)

    print("KERNEL_OK")
</pallas_src>

<mosaic_0001>
module attributes {stable_mosaic.version = 11 : i64} {
  func.func @_norm_kernel(%arg0: i32, %arg1: memref<8x512xf32, #tpu.memory_space<vmem>>, %arg2: memref<8x512xf32, #tpu.memory_space<vmem>>) attributes {dimension_semantics = [#tpu.dimension_semantics<parallel>], iteration_bounds = array<i64: 2>, scalar_prefetch = 0 : i64, scratch_operands = 0 : i64, tpu.core_type = #tpu.core_type<tc>, window_params = [{transform_indices = @transform_0, window_bounds = array<i64: 8, 512>}, {transform_indices = @transform_1, window_bounds = array<i64: 8, 512>}]} {
    %c0 = arith.constant 0 : index
    %c0_0 = arith.constant 0 : index
    %0 = vector.load %arg1[%c0, %c0_0] : memref<8x512xf32, #tpu.memory_space<vmem>>, vector<8x512xf32>
    %cst = arith.constant 1.000000e+00 : f32
    %1 = vector.broadcast %cst : f32 to vector<1x8xf32>
    %cst_1 = arith.constant dense<0.000000e+00> : vector<1x512xf32>
    %2 = tpu.matmul %1, %0, %cst_1 {dimension_numbers = #tpu.dot_dimension_numbers<[1], [0], [0], [1], [0, 0, 1, 1], [], []>, precision = #tpu.contract_precision<fp32>} : vector<1x8xf32>, vector<8x512xf32>, vector<1x512xf32> -> vector<1x512xf32>
    %cst_2 = arith.constant 1.250000e-01 : f32
    %3 = vector.broadcast %cst_2 : f32 to vector<1x512xf32>
    %4 = arith.mulf %2, %3 : vector<1x512xf32>
    %5 = vector.broadcast %4 : vector<1x512xf32> to vector<8x512xf32>
    %6 = arith.subf %0, %5 : vector<8x512xf32>
    %7 = arith.mulf %6, %6 : vector<8x512xf32>
    %cst_3 = arith.constant dense<0.000000e+00> : vector<1x512xf32>
    %8 = tpu.matmul %1, %7, %cst_3 {dimension_numbers = #tpu.dot_dimension_numbers<[1], [0], [0], [1], [0, 0, 1, 1], [], []>, precision = #tpu.contract_precision<fp32>} : vector<1x8xf32>, vector<8x512xf32>, vector<1x512xf32> -> vector<1x512xf32>
    %cst_4 = arith.constant 0.142857149 : f32
    %9 = vector.broadcast %cst_4 : f32 to vector<1x512xf32>
    %10 = arith.mulf %8, %9 : vector<1x512xf32>
    %11 = math.sqrt %10 : vector<1x512xf32>
    %cst_5 = arith.constant 9.99999974E-6 : f32
    %12 = vector.broadcast %cst_5 : f32 to vector<1x512xf32>
    %13 = arith.addf %11, %12 : vector<1x512xf32>
    %14 = tpu.reciprocal %13 : vector<1x512xf32> -> vector<1x512xf32>
    %15 = vector.broadcast %14 : vector<1x512xf32> to vector<8x512xf32>
    %16 = arith.mulf %6, %15 : vector<8x512xf32>
    %c0_6 = arith.constant 0 : index
    %c0_7 = arith.constant 0 : index
    %17 = vector.load %arg2[%c0_6, %c0_7] : memref<8x512xf32, #tpu.memory_space<vmem>>, vector<8x512xf32>
    tpu.vector_store %arg2[%c0_6, %c0_7], %16 {strides = array<i32>} : memref<8x512xf32, #tpu.memory_space<vmem>>, vector<8x512xf32>,
    return
  }
  func.func @transform_0(%arg0: i32) -> (i32, i32) {
    %c0_i32 = arith.constant 0 : i32
    %c0_i32_0 = arith.constant 0 : i32
    return %c0_i32, %arg0 : i32, i32
  }
  func.func @transform_1(%arg0: i32) -> (i32, i32) {
    %c0_i32 = arith.constant 0 : i32
    %c0_i32_0 = arith.constant 0 : i32
    return %c0_i32, %arg0 : i32, i32
  }
}

</mosaic_0001>

<bundles_post_ra>
// kernel: tpu_custom_call.1
= control target key start
LH: loop header
LB: loop body
LE: loop exit
PB: predicated region body
PF: predicated region fallthrough
CT: control target
= control target key end

     0   :  { %6 = vsyncpa [#allocation3], 0  ;;  %s2711_s0 = inlined_call_operand.hbm [shape: f32[8,1024], index: 0, kind: input, shape index: {}]   ;;  %s2712_s1 = inlined_call_operand.hbm [shape: f32[8,1024], index: 1, kind: output, shape index: {}]  }
   0x1   :  { %8 = vsyncpa [#allocation3 + $0x1], 0 }
   0x2   :  { %9 = vsyncpa [#allocation4], 0 }
   0x3   :  { %11 = vsyncpa [#allocation4 + $0x1], 0  ;;  %s2426_s6 = smov 0   ;;  %s2428_s7 = smov 0  }
   0x4   :  { %s2430_s8 = smov 0   ;;  %s2432_s9 = smov 0  }
   0x5 LB: > { %s2447_s10 = sadd.s32 4294967295, %s2409_s9   ;;  %s2180_s11 = sadd.s32 4294967294, %s2409_s9   ;;  %s2409_s9 = sphi %s2432_s9, %s2727_s9   ;;  %s2405_s8 = sphi %s2430_s8, %s2726_s8   ;;  %s2401_s7 = sphi %s2428_s7, %s2725_s7   ;;  %s2397_s6 = sphi %s2426_s6, %s2724_s6  }
   0x6   : > { %s2451_s12 = sadd.s32 1, %s2409_s9   ;;  %s24_s13 = sadd.s32 1, %s2405_s8 }
   0x7   : > { %s21_s14 = ssub.s32 %s2409_s9, %s2451_s12  ;;  %p31_p0 = scmp.ne.s32.totalorder %s2405_s8, %s2401_s7 }
   0x8   : > { %p22_p1 = scmp.eq.s32.totalorder %s21_s14, 0  ;;  %p32_p2 = scmp.eq.s32.totalorder %s2409_s9, 0 }
   0x9   : > { %p37_p3 = scmp.ne.s32.totalorder %s2401_s7, %s2397_s6  ;;  %p38_p4 = scmp.eq.s32.totalorder %s2447_s10, 0 }
   0xa   : > { %s2463_s15 = scalar_select %p22_p1, %s2405_s8, %s24_s13  }
   0xb   : > { %p2465_p5 = por %p32_p2, %p31_p0  ;;  %p2469_p6 = por %p38_p4, %p37_p3 }
   0xc   : > { %p61_p7 = scmp.eq.s32.totalorder %s2447_s10, 1  ;;  %p67_p8 = scmp.eq.s32.totalorder %s2180_s11, 1 }
   0xd   : > { %p2260_p10 = scmp.lt.s32.totalorder %s2409_s9, 2  ;;  %s87_s20 = sand.u32 1, %s2405_s8  }
   0xe   : > { %p2476_p11 = por %p61_p7, %p31_p0  ;;  %p2480_p12 = por %p67_p8, %p37_p3 }
   0xf   : > { %s2206_s21 = sshll.u32 %s2409_s9, 9  ;;  %s2183_s22 = sshll.u32 %s87_s20, 5 }
  0x10   : > { %s2716_s18 = scalar_select %p2476_p11, 1, 0 }
  0x11   : > { %s2717_s19 = scalar_select %p2480_p12, 1, 0 }
  0x12   : > { %s2489_s25 = scalar_lea.hbm %s2711_s0, %s2206_s21  ;;  %s91_s26 = scalar_lea.vmem [#allocation2], %s2183_s22 }
  0x13   : > { %s99_s27 = sshll.u32 %s91_s26, 4  ;;  %p2493_p13 = pnand %p2260_p10, %p2465_p5  ;;  %s2497_s27 = int_to_ptr.vmem [resolvable:$true] %s99_s27 }
  0x14   : > { %s88_s29 = scalar_lea.sflag [#allocation3], %s87_s20  ;;  %s2313_s30 = scalar_lea.hbm %s2489_s25, 512 }
  0x15   : > { %p2314_p2 = scmp.ne.s32.totalorder %s2489_s25, %s2313_s30  ;;  %p2315_p3 = pneg %p2493_p13 }
  0x16   : > { %s2318_s4 = scalar_lea.hbm %s2711_s0, 1024  ;;  %p2319_p5 = scmp.lt.u32.totalorder %s2489_s25, %s2711_s0 }
  0x17   : > { %p2316_p4 = pnand %p2315_p3, %p2314_p2  ;;  %p2320_p8 = scmp.lt.u32.totalorder %s2318_s4, %s2313_s30 }
  0x18   : > { %p2322_p9 = scmp.lt.u32.totalorder %s2313_s30, %s2489_s25 }
  0x19   : > { %p2317_p7 = pneg %p2316_p4  ;;  %p2321_p10 = por %p2320_p8, %p2319_p5 }
  0x1b   : > { %p2323_p0 = por %p2322_p9, %p2321_p10 }
  0x1d   : > { %p2324_p1 = pnand %p2323_p0, %p2317_p7 }
  0x1f   : > { %2327 = shalt.err (!%p2324_p1)
}
  0x20   : > { %s2328_s13 = scalar_lea.vmem %s2497_s27, 512  ;;  %s2411_s14 = smov [#allocation2]  }
  0x21   : > { %p2329_p2 = scmp.ne.s32.totalorder %s2497_s27, %s2328_s13  ;;  %s2333_s16 = sshll.u32 %s2411_s14, 4  ;;  %s2334_s16 = int_to_ptr.vmem [resolvable:$false] %s2333_s16 }
  0x22   : > { %s2335_s20 = scalar_lea.vmem %s2334_s16, 1024  ;;  %p2336_p11 = scmp.lt.s32.totalorder %s2497_s27, %s2334_s16 }
  0x23   : > { %p2331_p4 = pnand %p2329_p2, %p2315_p3  ;;  %p2337_p5 = scmp.lt.s32.totalorder %s2335_s20, %s2328_s13 }
  0x25   : > { %p2332_p12 = pneg %p2331_p4  ;;  %p2338_p8 = por %p2337_p5, %p2336_p11 }
  0x27   : > { %p2339_p9 = pnand %p2338_p8, %p2332_p12 }
  0x29   : > { %2342 = shalt.err (!%p2339_p9)
}
  0x2a   : > { %2255 = dma.hbm_to_vmem [thread:$0]  (!%p2493_p13), %s2489_s25, 512, %s2497_s27, %s88_s29  }
  0x2b   : > { %p2719_p0 = scmp.lt.s32.totalorder %s2409_s9, 3  ;;  %p2720_p1 = scmp.ge.s32.totalorder %s2409_s9, 1 }
  0x2d   : > { %p105_p3 = pnand %p2720_p1, %p2719_p0 }
  0x2e   : > { %s2531_s21 = sand.u32 (!%p105_p3), 1, %s2401_s7  }
  0x2f   : > { %108 = sbr.rel (%p105_p3) target bundleno = 633 (0x279), region = 24  ;;  %s2187_s22 = sshll.u32 (!%p105_p3), %s2531_s21, 5 }
  0x30   : > { %s111_s23 = scalar_lea.sflag (!%p105_p3), [#allocation3], %s2531_s21  ;;  %s114_s24 = scalar_lea.vmem (!%p105_p3), [#allocation2], %s2187_s22 }
  0x36   : > { %2388 = dma.done.wait (%p2469_p6), %s111_s23, 512  }
  0x37   : > { %2390 = vsyncadd (%p2469_p6), %s111_s23, 4294966784  ;;  %vm139_vm0 = vcmask 64512   ;;  %v2412_v0 = vmov 0.0   ;;  %v2413_v1 = vmov 0   ;;  %v2551_v6 = vld [vmem:[%s114_s24 + $0x8] sm:$0xff]  ;;  %v2553_v7 = vld [vmem:[%s114_s24 + $0x18] sm:$0xff]  ;;  %v1077_v32 = vlaneseq }
  0x38   : > { %209 = vmatprep.mubr.f32.mxu0 %v2412_v0  ;;  %674 = vmatprep.mubr.f32.mxu1 %v2412_v0  ;;  %v141_v2 = vsel %vm139_vm0, 1.0, %v2413_v1  ;;  %v2555_v8 = vld [vmem:[%s114_s24] sm:$0xff]  ;;  %v143_v9 = vand.u32 4294901760, %v2551_v6  ;;  %v608_v10 = vand.u32 4294901760, %v2553_v7  ;;  %v2560_v12 = vld [vmem:[%s114_s24 + $0x10] sm:$0xff]  ;;  %v2414_v31 = vmov 1.0  }
  0x39   : > { %v2544_v3 = vsub.f32 %v141_v2, %v141_v2  ;;  %v145_v11 = vand.u32 4294901760, %v2555_v8  ;;  %v610_v14 = vand.u32 4294901760, %v2560_v12  ;;  %v1078_v33 = vshrl.u32 %v1077_v32, 7  ;;  %s132_s17 = scalar_lea.vmem [#allocation5], %s2187_s22  ;;  %s2207_s25 = sshll.u32 %s2447_s10, 9 }
  0x3a   : > { %144 = vmatprep.subr.mxu0 %v143_v9  ;;  %609 = vmatprep.subr.mxu1 %v608_v10  ;;  %v222_v16 = vsub.f32 %v2551_v6, %v143_v9  ;;  %v687_v17 = vsub.f32 %v2553_v7, %v608_v10  ;;  %s2110_s26 = sshll.u32 %s132_s17, 4  ;;  %s2667_s29 = scalar_lea.hbm %s2712_s1, %s2207_s25  ;;  %s2669_s26 = int_to_ptr.vmem [resolvable:$true] %s2110_s26 }
  0x3b   : > { %v2547_v4 = vand.u32 4294901760, %v2544_v3  ;;  %v228_v15 = vsub.f32 %v2555_v8, %v145_v11  ;;  %146 = vmatpush1.msra.mxu0 %v145_v11  ;;  %611 = vmatpush1.msra.mxu1 %v610_v14  ;;  %v693_v18 = vsub.f32 %v2560_v12, %v610_v14  ;;  %v2599_v34 = vsub.s32 0, %v1078_v33  ;;  %s2096_s30 = scalar_lea.sflag [#allocation4], %s2531_s21  ;;  %s2343_s10 = scalar_lea.vmem %s2669_s26, 512 }
  0x3c   : > { %v223_v19 = vand.u32 4294901760, %v222_v16  ;;  %v688_v20 = vand.u32 4294901760, %v687_v17  ;;  %p2344_p6 = scmp.ne.s32.totalorder %s2669_s26, %s2343_s10  ;;  %p2721_p11 = scmp.ne.s32.totalorder %s2716_s18, 0 }
  0x3d   : > { %v213_v5 = vsub.f32 %v2544_v3, %v2547_v4  ;;  %v229_v21 = vand.u32 4294901760, %v228_v15  ;;  %v694_v22 = vand.u32 4294901760, %v693_v18  ;;  %s2415_s2 = smov [#allocation5]  }
  0x3e   : > { %v224_v23 = vsub.f32 %v222_v16, %v223_v19  ;;  %v689_v24 = vsub.f32 %v687_v17, %v688_v20  ;;  %p2345_p12 = pnand %p2344_p6, %p2721_p11  ;;  %s2347_s3 = sshll.u32 %s2415_s2, 4  ;;  %s2348_s3 = int_to_ptr.vmem [resolvable:$false] %s2347_s3 }
  0x3f   : > { %v2562_v13 = vand.u32 4294901760, %v213_v5  ;;  %v230_v25 = vsub.f32 %v228_v15, %v229_v21  ;;  %v695_v26 = vsub.f32 %v693_v18, %v694_v22  ;;  %s2349_s4 = scalar_lea.vmem %s2348_s3, 1024  ;;  %p2350_p7 = scmp.lt.s32.totalorder %s2669_s26, %s2348_s3 }
  0x40   : > { %v225_v27 = vand.u32 4294901760, %v224_v23  ;;  %v690_v28 = vand.u32 4294901760, %v689_v24  ;;  %p2346_p13 = pneg %p2345_p12  ;;  %p2351_p10 = scmp.lt.s32.totalorder %s2349_s4, %s2343_s10 }
  0x41   : > { %215 = vmatmul.mubr.f32.vlgmr.msra.gmra.mrb[0].mxu0 %v2562_v13  ;;  %680 = vmatmul.mubr.f32.vlgmr.msra.gmra.mrb[0].mxu1 %v2562_v13  ;;  %v231_v29 = vand.u32 4294901760, %v230_v25  ;;  %v696_v30 = vand.u32 4294901760, %v695_v26 }
  0x42   : > { %295 = vmatprep.mubr.f32.mxu0 %v2412_v0  ;;  %760 = vmatprep.mubr.f32.mxu1 %v2412_v0  ;;  %p2352_p2 = por %p2351_p10, %p2350_p7 }
  0x43   : > { %226 = vmatprep.subr.mxu0 %v225_v27  ;;  %691 = vmatprep.subr.mxu1 %v690_v28 }
  0x44   : > { %232 = vmatpush1.msra.mxu0 %v231_v29  ;;  %697 = vmatpush1.msra.mxu1 %v696_v30  ;;  %p2353_p4 = pnand %p2352_p2, %p2346_p13 }
  0x45   : > { %305 = vmatprep.subr.mxu0 %v222_v16  ;;  %770 = vmatprep.subr.mxu1 %v687_v17 }
  0x49   : > { %2189 = vmatmul.mubr.msk.f32.vlgmr.msra.gmra.mrb[0].mxu0 %vm139_vm0, %v2414_v31  ;;  %2192 = vmatmul.mubr.msk.f32.vlgmr.msra.gmra.mrb[0].mxu1 %vm139_vm0, %v2414_v31 }
  0x4a   : > { %308 = vmatpush1.msra.mxu0 %v228_v15  ;;  %371 = vmatprep.mubr.f32.mxu0 %v2412_v0 }
  0x4b   : > { %773 = vmatpush1.msra.mxu1 %v693_v18  ;;  %836 = vmatprep.mubr.f32.mxu1 %v2412_v0 }
  0x4c   : > { %381 = vmatprep.subr.mxu0 %v143_v9  ;;  %846 = vmatprep.subr.mxu1 %v608_v10 }
  0x51   : > { %374 = vmatmul.mubr.f32.vlgmr.msra.gmra.mrb[0].mxu0 %v2544_v3  ;;  %839 = vmatmul.mubr.f32.vlgmr.msra.gmra.mrb[0].mxu1 %v2544_v3 }
  0x52   : > { %383 = vmatpush1.msra.mxu0 %v145_v11  ;;  %446 = vmatprep.mubr.f32.mxu0 %v2412_v0 }
  0x53   : > { %848 = vmatpush1.msra.mxu1 %v610_v14  ;;  %911 = vmatprep.mubr.f32.mxu1 %v2412_v0 }
  0x54   : > { %459 = vmatprep.subr.mxu0 %v223_v19  ;;  %924 = vmatprep.subr.mxu1 %v688_v20 }
  0x59   : > { %450 = vmatmul.mubr.f32.vlgmr.msra.gmra.mrb[0].mxu0 %v2547_v4  ;;  %915 = vmatmul.mubr.f32.vlgmr.msra.gmra.mrb[0].mxu1 %v2547_v4 }
  0x5a   : > { %463 = vmatpush1.msra.mxu0 %v229_v21  ;;  %526 = vmatprep.mubr.f32.mxu0 %v2412_v0 }
  0x5b   : > { %928 = vmatpush1.msra.mxu1 %v694_v22  ;;  %991 = vmatprep.mubr.f32.mxu1 %v2412_v0 }
  0x5c   : > { %535 = vmatprep.subr.mxu0 %v143_v9  ;;  %1000 = vmatprep.subr.mxu1 %v608_v10 }
  0x61   : > { %2190 = vmatmul.mubr.msk.f32.vlgmr.msra.gmra.mrb[0].mxu0 %vm139_vm0, %v2414_v31  ;;  %2193 = vmatmul.mubr.msk.f32.vlgmr.msra.gmra.mrb[0].mxu1 %vm139_vm0, %v2414_v31 }
  0x62   : > { %537 = vmatpush1.msra.mxu0 %v145_v11  ;;  %600 = vmatprep.mubr.f32.mxu0 %v2412_v0 }
  0x63   : > { %1002 = vmatpush1.msra.mxu1 %v610_v14  ;;  %1065 = vmatprep.mubr.f32.mxu1 %v2412_v0 }
  0x69   : > { %2191 = vmatmul.mubr.msk.f32.vlgmr.msra.gmra.mrb[0].mxu0 %vm139_vm0, %v2414_v31  ;;  %2194 = vmatmul.mubr.msk.f32.vlgmr.msra.gmra.mrb[0].mxu1 %vm139_vm0, %v2414_v31 }
  0x6a   : > { %1167 = vmatprep.mubr.f32.mxu0 %v2412_v0  ;;  %1632 = vmatprep.mubr.f32.mxu1 %v2412_v0 }
 0x13c   : > { %v603_v35 = vpop.f32.mrb[0].mxu0  ;;  %v1068_v36 = vpop.f32.mrb[0].mxu1 }
 0x13d   : > { %v1073_v37 = vmul.f32 0.125, %v603_v35  ;;  %v1075_v38 = vmul.f32 0.125, %v1068_v36  ;;  %v605_v39 = vpop.f32.mrb[1].mxu0  ;;  %v1070_v40 = vpop.f32.mrb[1].mxu1 }
 0x13e   : > { %v1074_v41 = vmul.f32 0.125, %v605_v39  ;;  %v1076_v42 = vmul.f32 0.125, %v1070_v40 }
 0x13f   : > { %v1080_v43 = vrot.slane %v1073_v37, %v2599_v34  ;;  %v1088_v44 = vrot.slane %v1075_v38, %v2599_v34 }
 0x140   : > { %v1084_v45 = vrot.slane %v1074_v41, %v2599_v34  ;;  %v1092_v46 = vrot.slane %v1076_v42, %v2599_v34 }
 0x141   : > { %v2606_v47 = vsub.f32 %v2555_v8, %v1080_v43  ;;  %v2609_v48 = vsub.f32 %v2560_v12, %v1088_v44 }
 0x142   : > { %v2612_v49 = vsub.f32 %v2551_v6, %v1084_v45  ;;  %v2615_v50 = vsub.f32 %v2553_v7, %v1092_v46 }
 0x143   : > { %v1097_v51 = vmul.f32 %v2606_v47, %v2606_v47  ;;  %v1099_v52 = vmul.f32 %v2609_v48, %v2609_v48 }
 0x144   : > { %v1098_v53 = vmul.f32 %v2612_v49, %v2612_v49  ;;  %v1100_v54 = vmul.f32 %v2615_v50, %v2615_v50 }
 0x145   : > { %v1103_v55 = vand.u32 4294901760, %v1097_v51  ;;  %v1568_v56 = vand.u32 4294901760, %v1099_v52 }
 0x146   : > { %v1101_v57 = vand.u32 4294901760, %v1098_v53  ;;  %v1566_v58 = vand.u32 4294901760, %v1100_v54 }
 0x147   : > { %v1186_v59 = vsub.f32 %v1097_v51, %v1103_v55  ;;  %v1651_v60 = vsub.f32 %v1099_v52, %v1568_v56 }
 0x148   : > { %1102 = vmatprep.subr.mxu0 %v1101_v57  ;;  %1567 = vmatprep.subr.mxu1 %v1566_v58  ;;  %v1180_v61 = vsub.f32 %v1098_v53, %v1101_v57  ;;  %v1645_v62 = vsub.f32 %v1100_v54, %v1566_v58 }
 0x149   : > { %1104 = vmatpush1.msra.mxu0 %v1103_v55  ;;  %1569 = vmatpush1.msra.mxu1 %v1568_v56  ;;  %v1187_v63 = vand.u32 4294901760, %v1186_v59  ;;  %v1652_v1 = vand.u32 4294901760, %v1651_v60 }
 0x14a   : > { %1173 = vmatmul.mubr.f32.vlgmr.msra.gmra.mrb[2].mxu0 %v2562_v13  ;;  %1638 = vmatmul.mubr.f32.vlgmr.msra.gmra.mrb[2].mxu1 %v2562_v13  ;;  %v1181_v2 = vand.u32 4294901760, %v1180_v61  ;;  %v1646_v5 = vand.u32 4294901760, %v1645_v62 }
 0x14b   : > { %v1188_v6 = vsub.f32 %v1186_v59, %v1187_v63  ;;  %1253 = vmatprep.mubr.f32.mxu0 %v2412_v0  ;;  %v1653_v7 = vsub.f32 %v1651_v60, %v1652_v1  ;;  %1718 = vmatprep.mubr.f32.mxu1 %v2412_v0 }
 0x14c   : > { %v1182_v8 = vsub.f32 %v1180_v61, %v1181_v2  ;;  %v1647_v9 = vsub.f32 %v1645_v62, %v1646_v5 }
 0x14d   : > { %v1189_v12 = vand.u32 4294901760, %v1188_v6  ;;  %v1654_v14 = vand.u32 4294901760, %v1653_v7 }
 0x14e   : > { %v1183_v10 = vand.u32 4294901760, %v1182_v8  ;;  %v1648_v11 = vand.u32 4294901760, %v1647_v9 }
 0x150   : > { %1184 = vmatprep.subr.mxu0 %v1183_v10  ;;  %1649 = vmatprep.subr.mxu1 %v1648_v11 }
 0x151   : > { %1190 = vmatpush1.msra.mxu0 %v1189_v12  ;;  %1655 = vmatpush1.msra.mxu1 %v1654_v14 }
 0x152   : > { %2195 = vmatmul.mubr.msk.f32.vlgmr.msra.gmra.mrb[2].mxu0 %vm139_vm0, %v2414_v31  ;;  %1263 = vmatprep.subr.mxu0 %v1180_v61 }
 0x153   : > { %2198 = vmatmul.mubr.msk.f32.vlgmr.msra.gmra.mrb[2].mxu1 %vm139_vm0, %v2414_v31  ;;  %1728 = vmatprep.subr.mxu1 %v1645_v62 }
 0x154   : > { %1266 = vmatpush1.msra.mxu0 %v1186_v59  ;;  %1731 = vmatpush1.msra.mxu1 %v1651_v60 }
 0x155   : > { %1339 = vmatprep.subr.mxu0 %v1101_v57  ;;  %1804 = vmatprep.subr.mxu1 %v1566_v58 }
 0x156   : > { %1329 = vmatprep.mubr.f32.mxu0 %v2412_v0  ;;  %1794 = vmatprep.mubr.f32.mxu1 %v2412_v0 }
 0x15a   : > { %1332 = vmatmul.mubr.f32.vlgmr.msra.gmra.mrb[2].mxu0 %v2544_v3 }
 0x15b   : > { %1341 = vmatpush1.msra.mxu0 %v1103_v55  ;;  %1797 = vmatmul.mubr.f32.vlgmr.msra.gmra.mrb[2].mxu1 %v2544_v3 }
 0x15c   : > { %1806 = vmatpush1.msra.mxu1 %v1568_v56  ;;  %1417 = vmatprep.subr.mxu0 %v1181_v2 }
 0x15d   : > { %1882 = vmatprep.subr.mxu1 %v1646_v5  ;;  %1404 = vmatprep.mubr.f32.mxu0 %v2412_v0 }
 0x15e   : > { %1869 = vmatprep.mubr.f32.mxu1 %v2412_v0 }
 0x162   : > { %1408 = vmatmul.mubr.f32.vlgmr.msra.gmra.mrb[2].mxu0 %v2547_v4 }
 0x163   : > { %1421 = vmatpush1.msra.mxu0 %v1187_v63  ;;  %1873 = vmatmul.mubr.f32.vlgmr.msra.gmra.mrb[2].mxu1 %v2547_v4 }
 0x164   : > { %1886 = vmatpush1.msra.mxu1 %v1652_v1  ;;  %1493 = vmatprep.subr.mxu0 %v1101_v57 }
 0x165   : > { %1958 = vmatprep.subr.mxu1 %v1566_v58  ;;  %1484 = vmatprep.mubr.f32.mxu0 %v2412_v0 }
 0x166   : > { %1949 = vmatprep.mubr.f32.mxu1 %v2412_v0 }
 0x16a   : > { %2196 = vmatmul.mubr.msk.f32.vlgmr.msra.gmra.mrb[2].mxu0 %vm139_vm0, %v2414_v31 }
 0x16b   : > { %1495 = vmatpush1.msra.mxu0 %v1103_v55  ;;  %2199 = vmatmul.mubr.msk.f32.vlgmr.msra.gmra.mrb[2].mxu1 %vm139_vm0, %v2414_v31 }
 0x16c   : > { %1960 = vmatpush1.msra.mxu1 %v1568_v56  ;;  %1558 = vmatprep.mubr.f32.mxu0 %v2412_v0 }
 0x16d   : > { %2023 = vmatprep.mubr.f32.mxu1 %v2412_v0 }
 0x172   : > { %2197 = vmatmul.mubr.msk.f32.vlgmr.msra.gmra.mrb[2].mxu0 %vm139_vm0, %v2414_v31 }
 0x173   : > { %2200 = vmatmul.mubr.msk.f32.vlgmr.msra.gmra.mrb[2].mxu1 %vm139_vm0, %v2414_v31 }
 0x245   : > { %v1561_v3 = vpop.f32.mrb[2].mxu0 }
 0x246   : > { %v2031_v4 = vmul.f32 0.14285715, %v1561_v3  ;;  %v2026_v13 = vpop.f32.mrb[2].mxu1  ;;  %v1563_v15 = vpop.f32.mrb[3].mxu0 }
 0x247   : > { %v2033_v16 = vmul.f32 0.14285715, %v2026_v13  ;;  %v2032_v17 = vmul.f32 0.14285715, %v1563_v15  ;;  %v2028_v18 = vpop.f32.mrb[3].mxu1 }
 0x248   : > { %2297 = vrsqrt.f32 %v2031_v4  ;;  %v2034_v19 = vmul.f32 0.14285715, %v2028_v18  ;;  %vm2037_vm1 = vcmp.eq.f32.partialorder %v2031_v4, inf  ;;  %vm2039_vm2 = vcmp.eq.f32.partialorder %v2031_v4, 0.0 }
 0x249   : > { %2299 = vrsqrt.f32 %v2033_v16  ;;  %v2040_v23 = vand.u32 2147483648, %v2031_v4  ;;  %vm2051_vm3 = vcmp.eq.f32.partialorder %v2033_v16, inf  ;;  %vm2053_vm4 = vcmp.eq.f32.partialorder %v2033_v16, 0.0 }
 0x24a   : > { %2301 = vrsqrt.f32 %v2032_v17  ;;  %v2054_v26 = vand.u32 2147483648, %v2033_v16  ;;  %vm2044_vm5 = vcmp.eq.f32.partialorder %v2032_v17, inf  ;;  %v2047_v30 = vand.u32 2147483648, %v2032_v17 }
 0x24b   : > { %2303 = vrsqrt.f32 %v2034_v19  ;;  %vm2046_vm6 = vcmp.eq.f32.partialorder %v2032_v17, 0.0  ;;  %vm2058_vm7 = vcmp.eq.f32.partialorder %v2034_v19, inf  ;;  %v2061_v40 = vand.u32 2147483648, %v2034_v19 }
 0x24c   : > { %vm2060_vm8 = vcmp.eq.f32.partialorder %v2034_v19, 0.0 }
 0x252   : > { %v2298_v20 = vpop.eup %2297 }
 0x253   : > { %v2300_v0 = vpop.eup %2299  ;;  %v2036_v21 = vmul.f32 %v2298_v20, %v2031_v4 }
 0x254   : > { %v2302_v22 = vpop.eup %2301  ;;  %v2050_v24 = vmul.f32 %v2300_v0, %v2033_v16 }
 0x255   : > { %v2038_v25 = vsel %vm2037_vm1, %v2031_v4, %v2036_v21  ;;  %v2043_v27 = vmul.f32 %v2302_v22, %v2032_v17  ;;  %v2304_v31 = vpop.eup %2303 }
 0x256   : > { %v2041_v28 = vsel %vm2039_vm2, %v2040_v23, %v2038_v25  ;;  %v2052_v29 = vsel %vm2051_vm3, %v2033_v16, %v2050_v24  ;;  %v2057_v38 = vmul.f32 %v2304_v31, %v2034_v19 }
 0x257   : > { %v2063_v32 = vadd.f32 1e-05, %v2041_v28  ;;  %v2055_v33 = vsel %vm2053_vm4, %v2054_v26, %v2052_v29  ;;  %v2045_v35 = vsel %vm2044_vm5, %v2032_v17, %v2043_v27 }
 0x258   : > { %v2065_v36 = vadd.f32 1e-05, %v2055_v33  ;;  %v2048_v37 = vsel %vm2046_vm6, %v2047_v30, %v2045_v35  ;;  %v2059_v41 = vsel %vm2058_vm7, %v2034_v19, %v2057_v38 }
 0x259   : > { %2305 = vrcp.f32 %v2063_v32  ;;  %v2064_v39 = vadd.f32 1e-05, %v2048_v37  ;;  %v2062_v42 = vsel %vm2060_vm8, %v2061_v40, %v2059_v41 }
 0x25a   : > { %2307 = vrcp.f32 %v2065_v36  ;;  %v2066_v43 = vadd.f32 1e-05, %v2062_v42 }
 0x25b   : > { %2309 = vrcp.f32 %v2064_v39 }
 0x25c   : > { %2311 = vrcp.f32 %v2066_v43 }
 0x263   : > { %v2306_v44 = vpop.eup %2305 }
 0x264   : > { %v2308_v45 = vpop.eup %2307  ;;  %v2074_v46 = vrot.slane %v2306_v44, %v2599_v34 }
 0x265   : > { %v2310_v51 = vpop.eup %2309  ;;  %v2082_v52 = vrot.slane %v2308_v45, %v2599_v34 }
 0x266   : > { %v2078_v53 = vrot.slane %v2310_v51, %v2599_v34  ;;  %v2087_v54 = vmul.f32 %v2074_v46, %v2606_v47  ;;  %v2312_v56 = vpop.eup %2311 }
 0x267   : > { %v2089_v55 = vmul.f32 %v2082_v52, %v2609_v48  ;;  %v2086_v58 = vrot.slane %v2312_v56, %v2599_v34 }
 0x268   : > { %v2088_v57 = vmul.f32 %v2078_v53, %v2612_v49  ;;  %2091 = vst [vmem:[%s132_s17] sm:$0xff] %v2087_v54 }
 0x269   : > { %2093 = vst [vmem:[%s132_s17 + $0x10] sm:$0xff] %v2089_v55  ;;  %v2090_v59 = vmul.f32 %v2086_v58, %v2615_v50 }
 0x26a   : > { %2092 = vst [vmem:[%s132_s17 + $0x8] sm:$0xff] %v2088_v57 }
 0x26b   : > { %2094 = vst [vmem:[%s132_s17 + $0x18] sm:$0xff] %v2090_v59 }
 0x26c   : > { %2356 = shalt.err (!%p2353_p4)
}
 0x26d   : > { %s2357_s5 = scalar_lea.hbm %s2667_s29, 512  ;;  %s2361_s14 = scalar_lea.hbm %s2712_s1, 1024 }
 0x26e   : > { %p2358_p5 = scmp.ne.s32.totalorder %s2667_s29, %s2357_s5  ;;  %p2362_p0 = scmp.lt.u32.totalorder %s2667_s29, %s2712_s1 }
 0x26f   : > { %p2363_p1 = scmp.lt.u32.totalorder %s2361_s14, %s2357_s5  ;;  %p2365_p6 = scmp.lt.u32.totalorder %s2357_s5, %s2667_s29 }
 0x270   : > { %p2359_p8 = pnand %p2358_p5, %p2721_p11 }
 0x271   : > { %p2364_p3 = por %p2363_p1, %p2362_p0 }
 0x272   : > { %p2360_p9 = pneg %p2359_p8 }
 0x273   : > { %p2366_p12 = por %p2365_p6, %p2364_p3 }
 0x275   : > { %p2367_p13 = pnand %p2366_p12, %p2360_p9 }
 0x277   : > { %2370 = shalt.err (!%p2367_p13)
}
 0x278   : > { %2250 = dma.vmem_to_hbm [thread:$0]  (%p2721_p11), %s2669_s26, 512, %s2667_s29, %s2096_s30  }
 0x279 PF: > { %s2122_s21 = sand.u32 1, %s2397_s6   ;;  %p2722_p7 = scmp.ne.s32.totalorder %s2717_s19, 0 }
 0x27a   : > { %p2723_p10 = scmp.ge.s32.totalorder %s2409_s9, 2  ;;  %s2123_s22 = scalar_lea.sflag [#allocation4], %s2122_s21 }
 0x27c   : > { %p2257_p2 = pnand %p2723_p10, %p2722_p7 }
 0x27e   : > { %2392 = dma.done.wait (!%p2257_p2), %s2123_s22, 512  }
 0x27f   : > { %2394 = vsyncadd (!%p2257_p2), %s2123_s22, 4294966784  ;;  %p14_p4 = scmp.ge.s32.totalorder %s2451_s12, 4   ;;  %s2724_s6 = smov %s2401_s7 }
 0x280   : > { %s2725_s7 = smov %s2405_s8  ;;  %s2726_s8 = smov %s2463_s15 }
 0x281   : > { %s2727_s9 = smov %s2451_s12  ;;  %16 = sbr.rel (!%p14_p4) target bundleno = 5 (0x5), region = 69 }
 0x288   :  { %2128 = vsyncpa [#allocation3], 1 }
 0x289   :  { %2130 = vsyncpa [#allocation3 + $0x1], 1 }
 0x28a   :  { %2131 = vsyncpa [#allocation4], 1 }
 0x28b   :  { %2133 = vsyncpa [#allocation4 + $0x1], 1 }

</bundles_post_ra>
